<compile_context>
chip_gen: v7x
topology: tpu7x:2x2x1
jax: 0.10.0
libtpu: 0.0.40
codegen_flags: <defaults>
</compile_context>

<pallas_src>
import jax
import jax.numpy as jnp
from jax.experimental import pallas as pl
from jax.experimental.pallas import tpu as pltpu

_LANE = 128
_SUBLANE = 8
_MAX_CHUNKS = 8  # number of concurrent HBM->HBM DMAs


def _make_dma_copy_kernel(rows: int, chunk_rows: int, n_chunks: int):
    """Kernel: copy a (rows, 128) HBM array to HBM with n_chunks async DMAs."""

    def kernel(x_hbm, o_hbm, sems):
        copies = []
        for i in range(n_chunks):               # static Python loop
            start = i * chunk_rows
            size = min(chunk_rows, rows - start)
            if size <= 0:
                break
            cp = pltpu.make_async_copy(
                x_hbm.at[pl.ds(start, size), :],
                o_hbm.at[pl.ds(start, size), :],
                sems.at[i],
            )
            cp.start()
            copies.append(cp)
        for cp in copies:                        # overlap all DMAs, wait at end
            cp.wait()

    return kernel


def flatten(x: jax.Array, *, max_chunks: int = _MAX_CHUNKS) -> jax.Array:
    """Equivalent of torch `x.view(x.size(0), -1)`."""
    b = x.shape[0]
    flat = 1
    for d in x.shape[1:]:
        flat *= d
    out_shape = (b, flat)
    total = b * flat
    itemsize = jnp.dtype(x.dtype).itemsize

    # Dtype-aware packed-sublane granule: 8 rows/vreg for 32-bit, 16 for 16-bit,
    # 32 for 8-bit dtypes.  One "unit" = one fully packed (pack, 128) tile.
    pack = max(_SUBLANE, (_SUBLANE * 4) // max(itemsize, 1))
    unit = pack * _LANE

    # -------- fast path: metadata-only reshape, no kernel, no padding --------
    # Flatten requires no data movement; only launch the copy kernel when the
    # element count tiles cleanly (avoids pad/slice extra HBM passes entirely).
    if total == 0 or total % unit != 0:
        return jnp.reshape(x, out_shape)

    # -------- kernel path: chunked HBM->HBM DMA over the flat stream --------
    rows = total // _LANE                        # multiple of `pack`
    x2d = jnp.reshape(x, (rows, _LANE))          # metadata-only view

    n_chunks = max(1, min(max_chunks, rows // pack))
    chunk_rows = pl.cdiv(pl.cdiv(rows, n_chunks), pack) * pack
    n_used = pl.cdiv(rows, chunk_rows)

    y2d = pl.pallas_call(
        _make_dma_copy_kernel(rows, chunk_rows, n_used),
        out_shape=jax.ShapeDtypeStruct((rows, _LANE), x.dtype),
        in_specs=[pl.BlockSpec(memory_space=pl.ANY)],
        out_specs=pl.BlockSpec(memory_space=pl.ANY),
        scratch_shapes=[pltpu.SemaphoreType.DMA((n_used,))],
        cost_estimate=pl.CostEstimate(
            flops=0,
            transcendentals=0,
            bytes_accessed=2 * total * itemsize,
        ),
    )(x2d)

    return jnp.reshape(y2d, out_shape)           # metadata-only view


if __name__ == "__main__":
    key = jax.random.PRNGKey(0)

    # Primary case (matches the PyTorch module usage): small NCHW feature map.
    x = jax.random.normal(key, (2, 4, 16, 16), dtype=jnp.float32)
    y = jax.block_until_ready(flatten(x))
    y_ref = jnp.reshape(x, (x.shape[0], -1))
    assert y.shape == (2, 4 * 16 * 16), y.shape
    assert y.dtype == x.dtype
    assert bool(jnp.array_equal(y, y_ref))

    # Ragged element count (not a multiple of a packed tile): fast path, no kernel.
    x_odd = jax.random.normal(jax.random.PRNGKey(1), (2, 3, 5, 7), dtype=jnp.float32)
    y_odd = jax.block_until_ready(flatten(x_odd))
    assert bool(jnp.array_equal(y_odd, jnp.reshape(x_odd, (2, -1))))

    # Larger shape: exercises the multi-chunk DMA path.
    x_big = jax.random.normal(jax.random.PRNGKey(2), (8, 32, 64, 64), dtype=jnp.float32)
    y_big = jax.block_until_ready(flatten(x_big))
    assert bool(jnp.array_equal(y_big, jnp.reshape(x_big, (8, -1))))

    # bf16: exercises dtype-aware packed-sublane chunk alignment (pack = 16).
    x_bf = jax.random.normal(jax.random.PRNGKey(3), (2, 16, 16, 16)).astype(jnp.bfloat16)
    y_bf = jax.block_until_ready(flatten(x_bf))
    assert bool(jnp.array_equal(y_bf, jnp.reshape(x_bf, (2, -1))))

    print("KERNEL_OK")
</pallas_src>

<mosaic_0001>
module attributes {stable_mosaic.version = 11 : i64} {
  func.func @kernel(%arg0: memref<16x128xf32, #tpu.memory_space<any>>, %arg1: memref<16x128xf32, #tpu.memory_space<any>>, %arg2: memref<2x!tpu.dma_semaphore, #tpu.memory_space<semaphore_mem>>) attributes {dimension_semantics = [], scalar_prefetch = 0 : i64, scratch_operands = 1 : i64, tpu.core_type = #tpu.core_type<tc>} {
    %c0_i32 = arith.constant 0 : i32
    %c0_i32_0 = arith.constant 0 : i32
    %c0_i32_1 = arith.constant 0 : i32
    %0 = tpu.memref_slice %arg0[%c0_i32_0, %c0_i32_1] : memref<16x128xf32, #tpu.memory_space<any>> -> memref<8x128xf32, #tpu.memory_space<any>>
    %c0_i32_2 = arith.constant 0 : i32
    %c0_i32_3 = arith.constant 0 : i32
    %1 = tpu.memref_slice %arg1[%c0_i32_2, %c0_i32_3] : memref<16x128xf32, #tpu.memory_space<any>> -> memref<8x128xf32, #tpu.memory_space<any>>
    %2 = tpu.memref_slice %arg2[%c0_i32] : memref<2x!tpu.dma_semaphore, #tpu.memory_space<semaphore_mem>> -> memref<1x!tpu.dma_semaphore, #tpu.memory_space<semaphore_mem>>
    %3 = tpu.memref_squeeze %2 : memref<1x!tpu.dma_semaphore, #tpu.memory_space<semaphore_mem>> -> memref<!tpu.dma_semaphore, #tpu.memory_space<semaphore_mem>>
    tpu.enqueue_dma source(%0 : memref<8x128xf32, #tpu.memory_space<any>>) target(%1 : memref<8x128xf32, #tpu.memory_space<any>>) target_semaphore(%3 : memref<!tpu.dma_semaphore, #tpu.memory_space<semaphore_mem>>)
    %c1_i32 = arith.constant 1 : i32
    %c8_i32 = arith.constant 8 : i32
    %c0_i32_4 = arith.constant 0 : i32
    %4 = tpu.memref_slice %arg0[%c8_i32, %c0_i32_4] : memref<16x128xf32, #tpu.memory_space<any>> -> memref<8x128xf32, #tpu.memory_space<any>>
    %c8_i32_5 = arith.constant 8 : i32
    %c0_i32_6 = arith.constant 0 : i32
    %5 = tpu.memref_slice %arg1[%c8_i32_5, %c0_i32_6] : memref<16x128xf32, #tpu.memory_space<any>> -> memref<8x128xf32, #tpu.memory_space<any>>
    %6 = tpu.memref_slice %arg2[%c1_i32] : memref<2x!tpu.dma_semaphore, #tpu.memory_space<semaphore_mem>> -> memref<1x!tpu.dma_semaphore, #tpu.memory_space<semaphore_mem>>
    %7 = tpu.memref_squeeze %6 : memref<1x!tpu.dma_semaphore, #tpu.memory_space<semaphore_mem>> -> memref<!tpu.dma_semaphore, #tpu.memory_space<semaphore_mem>>
    tpu.enqueue_dma source(%4 : memref<8x128xf32, #tpu.memory_space<any>>) target(%5 : memref<8x128xf32, #tpu.memory_space<any>>) target_semaphore(%7 : memref<!tpu.dma_semaphore, #tpu.memory_space<semaphore_mem>>)
    %c0_i32_7 = arith.constant 0 : i32
    %c0_i32_8 = arith.constant 0 : i32
    %c0_i32_9 = arith.constant 0 : i32
    %8 = tpu.memref_slice %arg0[%c0_i32_8, %c0_i32_9] : memref<16x128xf32, #tpu.memory_space<any>> -> memref<8x128xf32, #tpu.memory_space<any>>
    %c0_i32_10 = arith.constant 0 : i32
    %c0_i32_11 = arith.constant 0 : i32
    %9 = tpu.memref_slice %arg1[%c0_i32_10, %c0_i32_11] : memref<16x128xf32, #tpu.memory_space<any>> -> memref<8x128xf32, #tpu.memory_space<any>>
    %10 = tpu.memref_slice %arg2[%c0_i32_7] : memref<2x!tpu.dma_semaphore, #tpu.memory_space<semaphore_mem>> -> memref<1x!tpu.dma_semaphore, #tpu.memory_space<semaphore_mem>>
    %11 = tpu.memref_squeeze %10 : memref<1x!tpu.dma_semaphore, #tpu.memory_space<semaphore_mem>> -> memref<!tpu.dma_semaphore, #tpu.memory_space<semaphore_mem>>
    tpu.wait_dma2 semaphore(%11 : memref<!tpu.dma_semaphore, #tpu.memory_space<semaphore_mem>>) src(%8 : memref<8x128xf32, #tpu.memory_space<any>>) dst(%9 : memref<8x128xf32, #tpu.memory_space<any>>)
    %c1_i32_12 = arith.constant 1 : i32
    %c8_i32_13 = arith.constant 8 : i32
    %c0_i32_14 = arith.constant 0 : i32
    %12 = tpu.memref_slice %arg0[%c8_i32_13, %c0_i32_14] : memref<16x128xf32, #tpu.memory_space<any>> -> memref<8x128xf32, #tpu.memory_space<any>>
    %c8_i32_15 = arith.constant 8 : i32
    %c0_i32_16 = arith.constant 0 : i32
    %13 = tpu.memref_slice %arg1[%c8_i32_15, %c0_i32_16] : memref<16x128xf32, #tpu.memory_space<any>> -> memref<8x128xf32, #tpu.memory_space<any>>
    %14 = tpu.memref_slice %arg2[%c1_i32_12] : memref<2x!tpu.dma_semaphore, #tpu.memory_space<semaphore_mem>> -> memref<1x!tpu.dma_semaphore, #tpu.memory_space<semaphore_mem>>
    %15 = tpu.memref_squeeze %14 : memref<1x!tpu.dma_semaphore, #tpu.memory_space<semaphore_mem>> -> memref<!tpu.dma_semaphore, #tpu.memory_space<semaphore_mem>>
    tpu.wait_dma2 semaphore(%15 : memref<!tpu.dma_semaphore, #tpu.memory_space<semaphore_mem>>) src(%12 : memref<8x128xf32, #tpu.memory_space<any>>) dst(%13 : memref<8x128xf32, #tpu.memory_space<any>>)
    return
  }
}

</mosaic_0001>

<bundles_post_ra>
// kernel: tpu_custom_call.1
= control target key start
LH: loop header
LB: loop body
LE: loop exit
PB: predicated region body
PF: predicated region fallthrough
CT: control target
= control target key end

     0   :  { %s64_s9 = smov [#allocation2]   ;;  %s65_s10 = smov [#allocation3]   ;;  %s91_s0 = inlined_call_operand.hbm [shape: f32[16,128], index: 0, kind: input, shape index: {}]   ;;  %s92_s1 = inlined_call_operand.hbm [shape: f32[16,128], index: 1, kind: output, shape index: {}]  }
   0x1   :  { %s19_s8 = scalar_lea.hbm %s91_s0, 128  ;;  %s66_s11 = smov 0  }
   0x2   :  { %18 = dma.general %s91_s0, 128, %s92_s1, %s64_s9, %s65_s10, [#allocation4], %s66_s11, 0  }
   0x3   :  { %s20_s18 = scalar_lea.hbm %s92_s1, 128  ;;  %s67_s19 = smov [#allocation2 + $0x1]  }
   0x4   :  { %s68_s20 = smov [#allocation5]  }
   0x5   :  { %34 = dma.general %s19_s8, 128, %s20_s18, %s67_s19, %s68_s20, [#allocation6], %s66_s11, 0  }
   0x6   :  { %60 = dma.done.wait [#allocation2], 128 }
   0x7   :  { %61 = vsyncadd [#allocation2], 4294967168 }
   0x8   :  { %62 = dma.done.wait [#allocation2 + $0x1], 128 }
   0x9   :  { %63 = vsyncadd [#allocation2 + $0x1], 4294967168 }
   0xa   :  { %40 = vsyncmov [#allocation2] }
   0xd   :  { %s41_s21 = vpop.sfrf %40 }
   0xe   :  { %p53_p0 = scmp.ne.s32.totalorder %s41_s21, 0 }
  0x10   :  { %45 = shalt.err (%p53_p0)  }
  0x11   :  { %47 = vsyncmov [#allocation2 + $0x1] }
  0x14   :  { %s48_s22 = vpop.sfrf %47 }
  0x15   :  { %p54_p1 = scmp.ne.s32.totalorder %s48_s22, 0 }
  0x17   :  { %52 = shalt.err (%p54_p1)  }

</bundles_post_ra>
